<compile_context>
chip_gen: v6e
topology: v6e:2x2x1
jax: 0.10.0
libtpu: 0.0.40
codegen_flags: <defaults>
</compile_context>

<pallas_src>
import functools

import jax
import jax.numpy as jnp
from jax.experimental import pallas as pl
from jax.experimental.pallas import tpu as pltpu

LOG_STD_MAX = 2.0
LOG_STD_MIN = -4.0


def _actor_kernel(x_ref, w1_ref, b1_ref, w2_ref, b2_ref, wh_ref, bh_ref,
                  out_ref, *, action_size):
    # x_ref: (S, TB) with the batch on the lane axis; weights (out, in),
    # biases (out, 1) broadcast over lanes.
    x = x_ref[...]

    # fc1 + relu   -> (H1, TB)
    h1 = jnp.dot(w1_ref[...], x, preferred_element_type=jnp.float32) + b1_ref[...]
    h1 = jnp.maximum(h1, 0.0)

    # fc2 + relu   -> (H2, TB)
    h2 = jnp.dot(w2_ref[...], h1.astype(w2_ref.dtype),
                 preferred_element_type=jnp.float32) + b2_ref[...]
    h2 = jnp.maximum(h2, 0.0)

    # fused heads: rows [0, A) = mean head, rows [A, 2A) = log_std head
    head = jnp.dot(wh_ref[...], h2.astype(wh_ref.dtype),
                   preferred_element_type=jnp.float32) + bh_ref[...]

    A = action_size
    out_ref[:A, :] = jnp.tanh(head[:A, :])
    out_ref[A:, :] = jnp.clip(head[A:, :], LOG_STD_MIN, LOG_STD_MAX)


def _round_up(x, m):
    return ((x + m - 1) // m) * m


def _choose_batch_tile(B):
    # Small batches: one full-extent block (no (8,128) constraint, no padding,
    # single grid step -- ideal on the 1-TC chips where steps are pure overhead).
    if B <= 256:
        return B
    # Large batches: lane-aligned tile sized so the grid has >= 2 "parallel"
    # steps (lets v7x shard the batch across its two TensorCores); capped so
    # very large batches still get big tiles without ballooning a single DMA.
    return min(_round_up(pl.cdiv(B, 2), 128), 4096)


def actor_forward(x, params):
    """Actor.forward.  x: (B, state_size) -> (mean, log_std), each (B, action_size).

    params: w1 (H1,S), b1 (H1,1), w2 (H2,H1), b2 (H2,1),
            w_head (2A,H2), b_head (2A,1)   (head fused at init time).
    """
    B, S = x.shape
    w1, b1 = params["w1"], params["b1"]
    w2, b2 = params["w2"], params["b2"]
    wh, bh = params["w_head"], params["b_head"]
    H1, H2 = w1.shape[0], w2.shape[0]
    A2 = wh.shape[0]
    A = A2 // 2

    tb = _choose_batch_tile(B)
    grid_b = pl.cdiv(B, tb)
    b_pad = grid_b * tb

    # Batch-on-lanes layout: activations are (features, batch).
    x_t = x.T.astype(w1.dtype)                      # (S, B)
    if b_pad != B:
        # Rare fallback (large non-tile-divisible batch); pads lane columns only.
        x_t = jnp.pad(x_t, ((0, 0), (0, b_pad - B)))

    kernel = functools.partial(_actor_kernel, action_size=A)

    packed = pl.pallas_call(
        kernel,
        out_shape=jax.ShapeDtypeStruct((A2, b_pad), jnp.float32),
        grid=(grid_b,),
        in_specs=[
            pl.BlockSpec((S, tb), lambda i: (0, i)),     # x: tiled over batch (lanes)
            pl.BlockSpec((H1, S), lambda i: (0, 0)),     # weights/biases VMEM-resident
            pl.BlockSpec((H1, 1), lambda i: (0, 0)),
            pl.BlockSpec((H2, H1), lambda i: (0, 0)),
            pl.BlockSpec((H2, 1), lambda i: (0, 0)),
            pl.BlockSpec((A2, H2), lambda i: (0, 0)),
            pl.BlockSpec((A2, 1), lambda i: (0, 0)),
        ],
        out_specs=pl.BlockSpec((A2, tb), lambda i: (0, i)),
        compiler_params=pltpu.CompilerParams(
            dimension_semantics=("parallel",),
        ),
    )(x_t, w1, b1, w2, b2, wh, bh)

    mean = packed[:A, :B].T
    log_std = packed[A:, :B].T
    return mean, log_std


def xavier_uniform(key, fan_out, fan_in):
    # PyTorch-native (out, in) layout; xavier bound is symmetric in fan_in/out.
    bound = jnp.sqrt(6.0 / (fan_in + fan_out))
    return jax.random.uniform(key, (fan_out, fan_in), jnp.float32, -bound, bound)


def init_actor_params(key, state_size, action_size, hidden_sizes):
    h1, h2 = hidden_sizes
    k1, k2, k3, k4 = jax.random.split(key, 4)
    wm = xavier_uniform(k3, action_size, h2)       # fc_mean
    wl = xavier_uniform(k4, action_size, h2)       # fc_log_std
    return {
        "w1": xavier_uniform(k1, h1, state_size),
        "b1": jnp.zeros((h1, 1), jnp.float32),
        "w2": xavier_uniform(k2, h2, h1),
        "b2": jnp.zeros((h2, 1), jnp.float32),
        # Head fusion hoisted to init (one-time), not per forward call.
        "w_head": jnp.concatenate([wm, wl], axis=0),         # (2A, H2)
        "b_head": jnp.zeros((2 * action_size, 1), jnp.float32),
    }


def cast_matmul_params(params, dtype):
    """One-time param prep: cast matmul weights (not biases) to `dtype`."""
    out = dict(params)
    for k in ("w1", "w2", "w_head"):
        out[k] = params[k].astype(dtype)
    return out


def actor_forward_ref(x, p):
    """Pure-JAX reference of Actor.forward (always computed in f32)."""
    w1 = p["w1"].astype(jnp.float32)
    w2 = p["w2"].astype(jnp.float32)
    wh = p["w_head"].astype(jnp.float32)
    A = p["w_head"].shape[0] // 2
    h = jnp.maximum(x @ w1.T + p["b1"].T, 0.0)
    h = jnp.maximum(h @ w2.T + p["b2"].T, 0.0)
    head = h @ wh.T + p["b_head"].T
    mean = jnp.tanh(head[:, :A])
    log_std = jnp.clip(head[:, A:], LOG_STD_MIN, LOG_STD_MAX)
    return mean, log_std


if __name__ == "__main__":
    key = jax.random.PRNGKey(0)
    k_param, k_x = jax.random.split(key)

    batch = 4
    state_size = 8
    hidden_sizes = (32, 32)
    action_size = 4

    params = init_actor_params(k_param, state_size, action_size, hidden_sizes)
    x = jax.random.normal(k_x, (batch, state_size), jnp.float32)

    mean, log_std = actor_forward(x, params)
    jax.block_until_ready((mean, log_std))

    mean_ref, log_std_ref = actor_forward_ref(x, params)
    assert mean.shape == (batch, action_size)
    assert log_std.shape == (batch, action_size)
    assert jnp.allclose(mean, mean_ref, atol=1e-5)
    assert jnp.allclose(log_std, log_std_ref, atol=1e-5)

    # Larger batch: 2 lane-aligned grid steps (tb=256), weights stay VMEM-resident,
    # outputs are fully lane-dense.
    x_big = jax.random.normal(k_x, (512, state_size), jnp.float32)
    mean_b, log_std_b = actor_forward(x_big, params)
    jax.block_until_ready((mean_b, log_std_b))
    mean_b_ref, log_std_b_ref = actor_forward_ref(x_big, params)
    assert jnp.allclose(mean_b, mean_b_ref, atol=1e-5)
    assert jnp.allclose(log_std_b, log_std_b_ref, atol=1e-5)

    # Optional bf16 matmul path (HBM-traffic lever on v6e/v7x); epilogue stays f32.
    params_bf16 = cast_matmul_params(params, jnp.bfloat16)
    mean_h, log_std_h = actor_forward(x_big, params_bf16)
    jax.block_until_ready((mean_h, log_std_h))
    assert jnp.allclose(mean_h, mean_b_ref, atol=5e-2)
    assert jnp.allclose(log_std_h, log_std_b_ref, atol=5e-2)

    print("KERNEL_OK")
</pallas_src>

<mosaic_0001>
module attributes {stable_mosaic.version = 11 : i64} {
  func.func @_actor_kernel(%arg0: i32, %arg1: memref<8x4xf32, #tpu.memory_space<vmem>>, %arg2: memref<32x8xf32, #tpu.memory_space<vmem>>, %arg3: memref<32x1xf32, #tpu.memory_space<vmem>>, %arg4: memref<32x32xf32, #tpu.memory_space<vmem>>, %arg5: memref<32x1xf32, #tpu.memory_space<vmem>>, %arg6: memref<8x32xf32, #tpu.memory_space<vmem>>, %arg7: memref<8x1xf32, #tpu.memory_space<vmem>>, %arg8: memref<8x4xf32, #tpu.memory_space<vmem>>) attributes {dimension_semantics = [#tpu.dimension_semantics<parallel>], iteration_bounds = array<i64: 1>, scalar_prefetch = 0 : i64, scratch_operands = 0 : i64, tpu.core_type = #tpu.core_type<tc>, window_params = [{transform_indices = @transform_0, window_bounds = array<i64: 8, 4>}, {pipeline_mode = #tpu.pipeline_mode<synchronous>, transform_indices = @transform_1, window_bounds = array<i64: 32, 8>}, {pipeline_mode = #tpu.pipeline_mode<synchronous>, transform_indices = @transform_2, window_bounds = array<i64: 32, 1>}, {pipeline_mode = #tpu.pipeline_mode<synchronous>, transform_indices = @transform_3, window_bounds = array<i64: 32, 32>}, {pipeline_mode = #tpu.pipeline_mode<synchronous>, transform_indices = @transform_4, window_bounds = array<i64: 32, 1>}, {pipeline_mode = #tpu.pipeline_mode<synchronous>, transform_indices = @transform_5, window_bounds = array<i64: 8, 32>}, {pipeline_mode = #tpu.pipeline_mode<synchronous>, transform_indices = @transform_6, window_bounds = array<i64: 8, 1>}, {transform_indices = @transform_7, window_bounds = array<i64: 8, 4>}]} {
    %c0 = arith.constant 0 : index
    %c0_0 = arith.constant 0 : index
    %0 = vector.load %arg1[%c0, %c0_0] : memref<8x4xf32, #tpu.memory_space<vmem>>, vector<8x4xf32>
    %c0_1 = arith.constant 0 : index
    %c0_2 = arith.constant 0 : index
    %1 = vector.load %arg2[%c0_1, %c0_2] : memref<32x8xf32, #tpu.memory_space<vmem>>, vector<32x8xf32>
    %cst = arith.constant dense<0.000000e+00> : vector<32x4xf32>
    %2 = tpu.matmul %1, %0, %cst {dimension_numbers = #tpu.dot_dimension_numbers<[1], [0], [0], [1], [0, 0, 1, 1], [], []>} : vector<32x8xf32>, vector<8x4xf32>, vector<32x4xf32> -> vector<32x4xf32>
    %c0_3 = arith.constant 0 : index
    %c0_4 = arith.constant 0 : index
    %3 = vector.load %arg3[%c0_3, %c0_4] : memref<32x1xf32, #tpu.memory_space<vmem>>, vector<32x1xf32>
    %4 = vector.broadcast %3 : vector<32x1xf32> to vector<32x4xf32>
    %5 = arith.addf %2, %4 : vector<32x4xf32>
    %cst_5 = arith.constant 0.000000e+00 : f32
    %6 = vector.broadcast %cst_5 : f32 to vector<32x4xf32>
    %7 = arith.maximumf %5, %6 : vector<32x4xf32>
    %c0_6 = arith.constant 0 : index
    %c0_7 = arith.constant 0 : index
    %8 = vector.load %arg4[%c0_6, %c0_7] : memref<32x32xf32, #tpu.memory_space<vmem>>, vector<32x32xf32>
    %cst_8 = arith.constant dense<0.000000e+00> : vector<32x4xf32>
    %9 = tpu.matmul %8, %7, %cst_8 {dimension_numbers = #tpu.dot_dimension_numbers<[1], [0], [0], [1], [0, 0, 1, 1], [], []>} : vector<32x32xf32>, vector<32x4xf32>, vector<32x4xf32> -> vector<32x4xf32>
    %c0_9 = arith.constant 0 : index
    %c0_10 = arith.constant 0 : index
    %10 = vector.load %arg5[%c0_9, %c0_10] : memref<32x1xf32, #tpu.memory_space<vmem>>, vector<32x1xf32>
    %11 = vector.broadcast %10 : vector<32x1xf32> to vector<32x4xf32>
    %12 = arith.addf %9, %11 : vector<32x4xf32>
    %cst_11 = arith.constant 0.000000e+00 : f32
    %13 = vector.broadcast %cst_11 : f32 to vector<32x4xf32>
    %14 = arith.maximumf %12, %13 : vector<32x4xf32>
    %c0_12 = arith.constant 0 : index
    %c0_13 = arith.constant 0 : index
    %15 = vector.load %arg6[%c0_12, %c0_13] : memref<8x32xf32, #tpu.memory_space<vmem>>, vector<8x32xf32>
    %cst_14 = arith.constant dense<0.000000e+00> : vector<8x4xf32>
    %16 = tpu.matmul %15, %14, %cst_14 {dimension_numbers = #tpu.dot_dimension_numbers<[1], [0], [0], [1], [0, 0, 1, 1], [], []>} : vector<8x32xf32>, vector<32x4xf32>, vector<8x4xf32> -> vector<8x4xf32>
    %c0_15 = arith.constant 0 : index
    %c0_16 = arith.constant 0 : index
    %17 = vector.load %arg7[%c0_15, %c0_16] : memref<8x1xf32, #tpu.memory_space<vmem>>, vector<8x1xf32>
    %18 = vector.broadcast %17 : vector<8x1xf32> to vector<8x4xf32>
    %19 = arith.addf %16, %18 : vector<8x4xf32>
    %20 = vector.extract_strided_slice %19 {offsets = [0, 0], sizes = [4, 4], strides = [1, 1]} : vector<8x4xf32> to vector<4x4xf32>
    %21 = math.tanh %20 : vector<4x4xf32>
    %c0_17 = arith.constant 0 : index
    %c0_18 = arith.constant 0 : index
    %22 = vector.load %arg8[%c0_17, %c0_18] : memref<8x4xf32, #tpu.memory_space<vmem>>, vector<4x4xf32>
    tpu.vector_store %arg8[%c0_17, %c0_18], %21 {strides = array<i32>} : memref<8x4xf32, #tpu.memory_space<vmem>>, vector<4x4xf32>,
    %23 = vector.extract_strided_slice %19 {offsets = [4, 0], sizes = [4, 4], strides = [1, 1]} : vector<8x4xf32> to vector<4x4xf32>
    %cst_19 = arith.constant -4.000000e+00 : f32
    %cst_20 = arith.constant 2.000000e+00 : f32
    %24 = vector.broadcast %cst_19 : f32 to vector<4x4xf32>
    %25 = arith.maximumf %24, %23 : vector<4x4xf32>
    %26 = vector.broadcast %cst_20 : f32 to vector<4x4xf32>
    %27 = arith.minimumf %26, %25 : vector<4x4xf32>
    %c4 = arith.constant 4 : index
    %c0_21 = arith.constant 0 : index
    %28 = vector.load %arg8[%c4, %c0_21] : memref<8x4xf32, #tpu.memory_space<vmem>>, vector<4x4xf32>
    tpu.vector_store %arg8[%c4, %c0_21], %27 {strides = array<i32>} : memref<8x4xf32, #tpu.memory_space<vmem>>, vector<4x4xf32>,
    return
  }
  func.func @transform_0(%arg0: i32) -> (i32, i32) {
    %c0_i32 = arith.constant 0 : i32
    %c0_i32_0 = arith.constant 0 : i32
    return %c0_i32, %arg0 : i32, i32
  }
  func.func @transform_1(%arg0: i32) -> (i32, i32) {
    %c0_i32 = arith.constant 0 : i32
    %c0_i32_0 = arith.constant 0 : i32
    %c0_i32_1 = arith.constant 0 : i32
    return %c0_i32, %c0_i32_0 : i32, i32
  }
  func.func @transform_2(%arg0: i32) -> (i32, i32) {
    %c0_i32 = arith.constant 0 : i32
    %c0_i32_0 = arith.constant 0 : i32
    %c0_i32_1 = arith.constant 0 : i32
    return %c0_i32, %c0_i32_0 : i32, i32
  }
  func.func @transform_3(%arg0: i32) -> (i32, i32) {
    %c0_i32 = arith.constant 0 : i32
    %c0_i32_0 = arith.constant 0 : i32
    %c0_i32_1 = arith.constant 0 : i32
    return %c0_i32, %c0_i32_0 : i32, i32
  }
  func.func @transform_4(%arg0: i32) -> (i32, i32) {
    %c0_i32 = arith.constant 0 : i32
    %c0_i32_0 = arith.constant 0 : i32
    %c0_i32_1 = arith.constant 0 : i32
    return %c0_i32, %c0_i32_0 : i32, i32
  }
  func.func @transform_5(%arg0: i32) -> (i32, i32) {
    %c0_i32 = arith.constant 0 : i32
    %c0_i32_0 = arith.constant 0 : i32
    %c0_i32_1 = arith.constant 0 : i32
    return %c0_i32, %c0_i32_0 : i32, i32
  }
  func.func @transform_6(%arg0: i32) -> (i32, i32) {
    %c0_i32 = arith.constant 0 : i32
    %c0_i32_0 = arith.constant 0 : i32
    %c0_i32_1 = arith.constant 0 : i32
    return %c0_i32, %c0_i32_0 : i32, i32
  }
  func.func @transform_7(%arg0: i32) -> (i32, i32) {
    %c0_i32 = arith.constant 0 : i32
    %c0_i32_0 = arith.constant 0 : i32
    return %c0_i32, %arg0 : i32, i32
  }
}

</mosaic_0001>

<bundles_post_ra>
// kernel: tpu_custom_call.1
= control target key start
LH: loop header
LB: loop body
LE: loop exit
PB: predicated region body
PF: predicated region fallthrough
CT: control target
= control target key end

     0   :  { %vm55_vm0 = vcmask 64512   ;;  %v445_v3 = vmov 0   ;;  %vm185_vm1 = vcmask 261120   ;;  %v446_v35 = vmov 0.0   ;;  %s560_s0 = inlined_call_operand.vmem [shape: f32[8,4], index: 0, kind: input, shape index: {}]   ;;  %s561_s1 = inlined_call_operand.vmem [shape: f32[32,8], index: 1, kind: input, shape index: {}]   ;;  %s562_s2 = inlined_call_operand.vmem [shape: f32[32,1], index: 2, kind: input, shape index: {}]   ;;  %s563_s4 = inlined_call_operand.vmem [shape: f32[32,1], index: 4, kind: input, shape index: {}]   ;;  %s564_s6 = inlined_call_operand.vmem [shape: f32[8,1], index: 6, kind: input, shape index: {}]   ;;  %s565_s3 = inlined_call_operand.vmem [shape: f32[32,32], index: 3, kind: input, shape index: {}]   ;;  %s566_s5 = inlined_call_operand.vmem [shape: f32[8,32], index: 5, kind: input, shape index: {}]   ;;  %s567_s7 = inlined_call_operand.vmem [shape: f32[8,4], index: 7, kind: output, shape index: {}]  }
   0x1   :  { %v26_v0 = vld [vmem:[%s560_s0] sm:$0xff]  ;;  %v28_v2 = vld [vmem:[%s561_s1 + $0x8] sm:$0xff]  ;;  %441 = vset.pattern.permute.xlu0 %v445_v3  ;;  %442 = vset.pattern.permute.xlu1 %v445_v3  ;;  %v29_v4 = vld [vmem:[%s561_s1 + $0x10] sm:$0xff]  ;;  %vm447_vm2 = vmmov 0   ;;  %vm372_vm3 = vcmask 31748   ;;  %vm368_vm4 = vcmask 27648  }
   0x2   :  { %v27_v1 = vld [vmem:[%s561_s1] sm:$0xff]  ;;  %405 = vmatprep.subr.mxu0 %v26_v0  ;;  %v34_v5 = vld [vmem:[%s562_s2 + $0x18] sm:$0xff]  ;;  %v32_v6 = vld [vmem:[%s562_s2 + $0x8] sm:$0xff] }
   0x3   :  { %407 = vmatprep.mubr.msk.f32.mxu0 %vm55_vm0, %v27_v1  ;;  %406 = vmatpush3.msra.mxu0 %v26_v0  ;;  %v33_v7 = vld [vmem:[%s562_s2 + $0x10] sm:$0xff]  ;;  %v30_v8 = vld [vmem:[%s561_s1 + $0x18] sm:$0xff]  ;;  %v31_v9 = vld [vmem:[%s562_s2] sm:$0xff] }
   0x4   :  { %52 = vperm.xlu0 %441, %v34_v5   ;;  %408 = vmatmul.mubr.msk.f32.vlgmr.msra.gmra.mxu0 %vm55_vm0, %v28_v2  ;;  %v164_v10 = vld [vmem:[%s563_s4 + $0x18] sm:$0xff]  ;;  %v163_v11 = vld [vmem:[%s563_s4 + $0x10] sm:$0xff]  ;;  %v162_v12 = vld [vmem:[%s563_s4 + $0x8] sm:$0xff] }
   0x5   :  { %42 = vperm.xlu1 %442, %v32_v6   ;;  %410 = vmatprep.mubr.msk.f32.mxu0 %vm55_vm0, %v29_v4  ;;  %v161_v13 = vld [vmem:[%s563_s4] sm:$0xff]  ;;  %v158_v32 = vld [vmem:[%s565_s3 + $0x8] sm:$0xff]  ;;  %v159_v33 = vld [vmem:[%s565_s3 + $0x10] sm:$0xff] }
   0x6   :  { %v288_v14 = vld [vmem:[%s564_s6] sm:$0xff]  ;;  %v160_v34 = vld [vmem:[%s565_s3 + $0x18] sm:$0xff]  ;;  %427 = vmatprep.subr.mxu0 %v446_v35 }
   0x7   :  { %v157_v15 = vld [vmem:[%s565_s3] sm:$0xff] }
   0x8   :  { %47 = vperm.xlu0 %441, %v33_v7   ;;  %411 = vmatmul.mubr.msk.f32.gmra.mxu0 %vm55_vm0, %v30_v8  ;;  %v287_v52 = vld [vmem:[%s566_s5] sm:$0xff] }
   0x9   :  { %37 = vperm.xlu1 %442, %v31_v9   ;;  %421 = vmatprep.mubr.msk.f32.mxu1 %vm185_vm1, %v157_v15 }
   0xa   :  { %435 = vmatprep.mubr.msk.f32.mxu0 %vm447_vm2, %v446_v35 }
   0xc   :  { %182 = vperm.xlu0 %441, %v164_v10  }
   0xd   :  { %177 = vperm.xlu1 %442, %v163_v11  }
  0x10   :  { %172 = vperm.xlu0 %441, %v162_v12  }
  0x11   :  { %167 = vperm.xlu1 %442, %v161_v13  }
  0x14   :  { %291 = vperm.xlu0 %441, %v288_v14  }
  0x7f   :  { %v53_v16 = vpop.permute.xlu0 %52 }
  0x80   :  { %v43_v18 = vpop.permute.xlu1 %42 }
  0x83   :  { %v48_v22 = vpop.permute.xlu0 %47 }
  0x84   :  { %v38_v27 = vpop.permute.xlu1 %37 }
  0x87   :  { %v183_v36 = vpop.permute.xlu0 %182 }
  0x88   :  { %v178_v38 = vpop.permute.xlu1 %177 }
  0x8b   :  { %v173_v42 = vpop.permute.xlu0 %172 }
  0x8c   :  { %v168_v47 = vpop.permute.xlu1 %167 }
  0x8f   :  { %v292_v53 = vpop.permute.xlu0 %291 }
  0xc4   :  { %v409_v17 = vpop.f32.mrf.mxu0 }
  0xc5   :  { %v140_v24 = vadd.f32 %v409_v17, %v43_v18 }
  0xc6   :  { %v134_v19 = vpop.f32.mrf.mxu0 }
  0xc7   :  { %v135_v28 = vadd.f32 %v134_v19, %v38_v27  ;;  %v154_v30 = vmax.f32 %v140_v24, 0.0 }
  0xc8   :  { %v412_v20 = vpop.f32.mrf.mxu0 }
  0xc9   :  { %v150_v21 = vadd.f32 %v412_v20, %v53_v16  ;;  %v153_v31 = vmax.f32 %v135_v28, 0.0 }
  0xca   :  { %v144_v23 = vpop.f32.mrf.mxu0 }
  0xcb   :  { %v156_v25 = vmax.f32 %v150_v21, 0.0  ;;  %v145_v26 = vadd.f32 %v144_v23, %v48_v22 }
  0xcd   :  { %v155_v29 = vmax.f32 %v145_v26, 0.0  ;;  %413 = vmatprep.subr.mxu1 %v156_v25 }
  0xce   :  { %414 = vmatpush3.msra.mxu1 %v156_v25 }
  0xcf   :  { %415 = vmatprep.subr.mxu1 %v155_v29 }
  0xd0   :  { %416 = vmatpush3.msra.mxu1 %v155_v29 }
  0xd1   :  { %417 = vmatprep.subr.mxu1 %v154_v30 }
  0xd2   :  { %418 = vmatpush3.msra.mxu1 %v154_v30 }
  0xd3   :  { %419 = vmatprep.subr.mxu1 %v153_v31 }
  0xd4   :  { %420 = vmatpush3.msra.mxu1 %v153_v31 }
  0xd5   :  { %422 = vmatmul.mubr.msk.f32.vlgmr.msra.gmra.mxu1 %vm185_vm1, %v158_v32 }
  0xd6   :  { %424 = vmatprep.mubr.msk.f32.mxu1 %vm185_vm1, %v159_v33 }
  0xd9   :  { %425 = vmatmul.mubr.msk.f32.gmra.mxu1 %vm185_vm1, %v160_v34 }
 0x195   :  { %v423_v37 = vpop.f32.mrf.mxu1 }
 0x196   :  { %v270_v44 = vadd.f32 %v423_v37, %v173_v42 }
 0x197   :  { %v264_v39 = vpop.f32.mrf.mxu1 }
 0x198   :  { %v265_v48 = vadd.f32 %v264_v39, %v168_v47  ;;  %v284_v50 = vmax.f32 %v270_v44, 0.0 }
 0x199   :  { %v426_v40 = vpop.f32.mrf.mxu1 }
 0x19a   :  { %v280_v41 = vadd.f32 %v426_v40, %v183_v36  ;;  %v283_v51 = vmax.f32 %v265_v48, 0.0 }
 0x19b   :  { %v274_v43 = vpop.f32.mrf.mxu1 }
 0x19c   :  { %v286_v45 = vmax.f32 %v280_v41, 0.0  ;;  %v275_v46 = vadd.f32 %v274_v43, %v178_v38 }
 0x19e   :  { %v285_v49 = vmax.f32 %v275_v46, 0.0  ;;  %428 = vmatpush3.msra.mxu0 %v286_v45 }
 0x19f   :  { %429 = vmatprep.subr.mxu0 %v446_v35 }
 0x1a0   :  { %430 = vmatpush3.msra.mxu0 %v285_v49 }
 0x1a1   :  { %431 = vmatprep.subr.mxu0 %v446_v35 }
 0x1a2   :  { %432 = vmatpush3.msra.mxu0 %v284_v50 }
 0x1a3   :  { %433 = vmatprep.subr.mxu0 %v446_v35 }
 0x1a4   :  { %434 = vmatpush3.msra.mxu0 %v283_v51 }
 0x1a5   :  { %436 = vmatmul.mubr.msk.f32.vlgmr.msra.gmra.mxu0 %vm185_vm1, %v287_v52 }
 0x265   :  { %v363_v54 = vpop.f32.mrf.mxu0 }
 0x266   :  { %v364_v55 = vadd.f32 %v363_v54, %v292_v53 }
 0x267   :  { %v437_v56 = vpop.f32.mrf.mxu0 }
 0x268   :  { %443 = vtanh.f32 %v364_v55  ;;  %v370_v57 = vmax.f32 %v364_v55, -4.0 }
 0x26a   :  { %v371_v58 = vmin.f32 %v370_v57, 2.0 }
 0x26c   :  { %373 = vst.msk [vmem:[%s567_s7] sm:$0xf0] %vm372_vm3, %v371_v58 }
 0x275   :  { %v444_v59 = vpop.eup %443 }
 0x276   :  { %369 = vst.msk [vmem:[%s567_s7] sm:$0xf] %vm368_vm4, %v444_v59 }

</bundles_post_ra>
